<compile_context>
chip_gen: v7x
topology: tpu7x:2x2x1
jax: 0.10.0
libtpu: 0.0.40
codegen_flags: <defaults>
</compile_context>

<pallas_src>
import functools

import jax
import jax.numpy as jnp
from jax import lax
from jax.experimental import pallas as pl
from jax.experimental.pallas import tpu as pltpu


def _decoder_kernel(x_ref,       # (T*Bp, L)    time-major, batch-padded input
                    wlstm_ref,   # (L+H, 4H)    rows [0:L]=W_ih^T, rows [L:L+H]=W_hh^T (gate order i,f,g,o)
                    bias_ref,    # (3, >=4H)    row0=b_ih+b_hh, row1=b_lin (first W lanes), row2=b_lin1 (first C*W lanes)
                    whead_ref,   # (H+W, C*W)   rows [0:H]=W_lin^T (lane-padded), rows [H:H+W]=W_lin1^T
                    out_ref,     # (T*Bp, C*W)  output slab
                    *, seq_len, batch, latent, hidden, window, out_width):
    T, Bp, L, H, W, CW = seq_len, batch, latent, hidden, window, out_width
    G = 4 * H

    # ---- Hoisted input projection: one MXU pass, result stays in vregs -----
    w_ih = wlstm_ref[0:L, :]                              # (L, 4H)
    b_gates = bias_ref[0:1, 0:G]                          # (1, 4H)
    gx = jnp.dot(x_ref[...], w_ih,
                 preferred_element_type=jnp.float32) + b_gates   # (T*Bp, 4H)

    # Recurrent weights stay resident in vregs across the unrolled loop.
    w_hh = wlstm_ref[L:L + H, :]                          # (H, 4H)

    # Lane masks implementing sigmoid(x) = 0.5*tanh(0.5*x) + 0.5 on the
    # i/f/o lane blocks while keeping the cell-gate (g) block a plain tanh.
    # `scale` doubles as both the pre-tanh argument scale and the post-tanh
    # multiplier; precomputed once (hoisted) so the loop only adds a VPU
    # mul + mul + add around a single full-width EUP tanh.
    lane = lax.broadcasted_iota(jnp.int32, (Bp, G), 1)
    is_g = (lane >= 2 * H) & (lane < 3 * H)
    scale = jnp.where(is_g, 1.0, 0.5).astype(jnp.float32)    # (Bp, 4H)
    offset = jnp.where(is_g, 0.0, 0.5).astype(jnp.float32)   # (Bp, 4H)

    h = jnp.zeros((Bp, H), jnp.float32)
    c = jnp.zeros((Bp, H), jnp.float32)
    hs = []
    # T is small & static: full Python unroll keeps every slice static and
    # everything register-resident.
    for t in range(T):
        gates = gx[t * Bp:(t + 1) * Bp, :] + jnp.dot(
            h, w_hh, preferred_element_type=jnp.float32)       # (Bp, 4H)
        act = jnp.tanh(gates * scale) * scale + offset         # one EUP pass
        i_g = act[:, 0 * H:1 * H]
        f_g = act[:, 1 * H:2 * H]
        g_g = act[:, 2 * H:3 * H]
        o_g = act[:, 3 * H:4 * H]
        c = f_g * c + i_g * g_g
        h = o_g * jnp.tanh(c)
        hs.append(h)

    hs_all = jnp.concatenate(hs, axis=0)                   # (T*Bp, H), in vregs

    # ---- Hoisted output head: batched over all T*Bp rows, single store -----
    w_lin = whead_ref[0:H, 0:W]                            # (H, W)
    b_lin = bias_ref[1:2, 0:W]                             # (1, W)
    w_lin1 = whead_ref[H:H + W, :]                         # (W, C*W)
    b_lin1 = bias_ref[2:3, 0:CW]                           # (1, C*W)

    y = jnp.dot(hs_all, w_lin, preferred_element_type=jnp.float32) + b_lin
    y = jnp.maximum(y, 0.0)
    y = jnp.dot(y, w_lin1, preferred_element_type=jnp.float32) + b_lin1
    out_ref[...] = y                                       # single bulk store


def lstmae_decoder_forward(x, params, *, window_size, channels):
    """x: (B, T, latent) float32. Returns (B*T, channels, window_size)."""
    B, T, L = x.shape
    H = params["w_hh"].shape[1]          # w_hh: (4H, H)
    W = window_size
    CW = window_size * channels
    Bp = ((B + 7) // 8) * 8              # pad batch to the f32 sublane tile

    # Tiling assumptions made inside the kernel (full-vreg gate tile, aligned
    # sublane slices).  Assert so a different config doesn't silently change
    # layout behavior.
    assert Bp % 8 == 0, "padded batch must be a multiple of the 8-row sublane tile"
    assert (4 * H) % 128 == 0, "4*hidden must be a multiple of the 128-lane tile"
    assert CW >= W, "channels must be >= 1"

    # --- Consolidated parameter slabs (4 input DMAs instead of 8) -----------
    # Packed LSTM weights: rows [0:L]=W_ih^T, rows [L:L+H]=W_hh^T.
    w_lstm = jnp.concatenate(
        [params["w_ih"].T, params["w_hh"].T], axis=0).astype(jnp.float32)  # (L+H, 4H)

    # Packed, lane-padded biases.
    bias_width = max(4 * H, CW, W)
    biases = jnp.zeros((3, bias_width), jnp.float32)
    biases = biases.at[0, :4 * H].set(params["b_ih"] + params["b_hh"])
    biases = biases.at[1, :W].set(params["b_lin"])
    biases = biases.at[2, :CW].set(params["b_lin1"])

    # Packed head weights: rows [0:H]=W_lin^T (zero lane-padded W->C*W),
    # rows [H:H+W]=W_lin1^T.
    w_lin_t = jnp.pad(params["w_lin"].T, ((0, 0), (0, CW - W)))            # (H, CW)
    w_head = jnp.concatenate(
        [w_lin_t, params["w_lin1"].T], axis=0).astype(jnp.float32)         # (H+W, CW)

    # Time-major, batch-padded, flattened input: (T, Bp, L) -> (T*Bp, L).
    x_tbl = jnp.transpose(x, (1, 0, 2))              # (T, B, L)
    if Bp != B:
        x_tbl = jnp.pad(x_tbl, ((0, 0), (0, Bp - B), (0, 0)))
    x_flat = x_tbl.reshape(T * Bp, L).astype(jnp.float32)

    kernel = functools.partial(_decoder_kernel, seq_len=T, batch=Bp, latent=L,
                               hidden=H, window=W, out_width=CW)
    vmem = pl.BlockSpec(memory_space=pltpu.MemorySpace.VMEM)

    out_flat = pl.pallas_call(
        kernel,
        out_shape=jax.ShapeDtypeStruct((T * Bp, CW), jnp.float32),
        in_specs=[vmem] * 4,
        out_specs=vmem,
    )(x_flat, w_lstm, biases, w_head)

    out = out_flat.reshape(T, Bp, CW)[:, :B, :]      # drop batch padding
    out = jnp.transpose(out, (1, 0, 2))              # (B, T, C*W)
    return out.reshape(-1, channels, window_size)    # (B*T, C, W)


def _reference_forward(x, params, *, window_size, channels):
    """Pure-JAX reference mirroring the PyTorch module (for verification)."""
    B, T, L = x.shape
    H = params["w_hh"].shape[1]
    w_ih, w_hh = params["w_ih"], params["w_hh"]
    b = params["b_ih"] + params["b_hh"]

    def cell(carry, x_t):
        h, c = carry
        gates = x_t @ w_ih.T + h @ w_hh.T + b
        i = jax.nn.sigmoid(gates[:, 0 * H:1 * H])
        f = jax.nn.sigmoid(gates[:, 1 * H:2 * H])
        g = jnp.tanh(gates[:, 2 * H:3 * H])
        o = jax.nn.sigmoid(gates[:, 3 * H:4 * H])
        c = f * c + i * g
        h = o * jnp.tanh(c)
        return (h, c), h

    h0 = jnp.zeros((B, H), jnp.float32)
    c0 = jnp.zeros((B, H), jnp.float32)
    _, hs = lax.scan(cell, (h0, c0), jnp.transpose(x, (1, 0, 2)))   # (T, B, H)
    hs = jnp.transpose(hs, (1, 0, 2))                               # (B, T, H)
    y = hs @ params["w_lin"].T + params["b_lin"]
    y = jnp.maximum(y, 0.0)
    y = y @ params["w_lin1"].T + params["b_lin1"]
    return y.reshape(-1, channels, window_size)


def _init_params(key, latent_size, hidden_size, window_size, channels):
    """Deterministic uniform init matching PyTorch parameter shapes."""
    ks = jax.random.split(key, 8)
    H, L, W, C = hidden_size, latent_size, window_size, channels
    k_lstm = 1.0 / jnp.sqrt(H)
    k_lin = 1.0 / jnp.sqrt(H)
    k_lin1 = 1.0 / jnp.sqrt(W)
    u = lambda k, shape, s: jax.random.uniform(k, shape, jnp.float32, -s, s)
    return {
        "w_ih":   u(ks[0], (4 * H, L), k_lstm),
        "w_hh":   u(ks[1], (4 * H, H), k_lstm),
        "b_ih":   u(ks[2], (4 * H,), k_lstm),
        "b_hh":   u(ks[3], (4 * H,), k_lstm),
        "w_lin":  u(ks[4], (W, H), k_lin),
        "b_lin":  u(ks[5], (W,), k_lin),
        "w_lin1": u(ks[6], (C * W, W), k_lin1),
        "b_lin1": u(ks[7], (C * W,), k_lin1),
    }


if __name__ == "__main__":
    # Small shapes consistent with the module:
    B, T = 2, 8                 # batch, sequence length
    LATENT, HIDDEN = 32, 32
    WINDOW, CHANNELS = 16, 4

    key = jax.random.PRNGKey(0)
    k_x, k_p = jax.random.split(key)
    x = jax.random.normal(k_x, (B, T, LATENT), jnp.float32)
    params = _init_params(k_p, LATENT, HIDDEN, WINDOW, CHANNELS)

    fwd = jax.jit(functools.partial(
        lstmae_decoder_forward, window_size=WINDOW, channels=CHANNELS))
    out = fwd(x, params)
    jax.block_until_ready(out)

    assert out.shape == (B * T, CHANNELS, WINDOW), out.shape

    ref = _reference_forward(x, params, window_size=WINDOW, channels=CHANNELS)
    # sigmoid is computed via the exact tanh identity inside the kernel;
    # tolerance covers EUP approximation differences only.
    assert jnp.allclose(out, ref, rtol=1e-3, atol=1e-4), float(
        jnp.max(jnp.abs(out - ref)))

    print("KERNEL_OK")
</pallas_src>

<mosaic_0001>
module attributes {stable_mosaic.version = 11 : i64} {
  func.func @_decoder_kernel(%arg0: memref<64x32xf32, #tpu.memory_space<vmem>>, %arg1: memref<64x128xf32, #tpu.memory_space<vmem>>, %arg2: memref<3x128xf32, #tpu.memory_space<vmem>>, %arg3: memref<48x64xf32, #tpu.memory_space<vmem>>, %arg4: memref<64x64xf32, #tpu.memory_space<vmem>>) attributes {dimension_semantics = [], scalar_prefetch = 0 : i64, scratch_operands = 0 : i64, tpu.core_type = #tpu.core_type<tc>} {
    %c0 = arith.constant 0 : index
    %c0_0 = arith.constant 0 : index
    %0 = vector.load %arg1[%c0, %c0_0] : memref<64x128xf32, #tpu.memory_space<vmem>>, vector<32x128xf32>
    %c0_1 = arith.constant 0 : index
    %c0_2 = arith.constant 0 : index
    %1 = vector.load %arg2[%c0_1, %c0_2] : memref<3x128xf32, #tpu.memory_space<vmem>>, vector<1x128xf32>
    %c0_3 = arith.constant 0 : index
    %c0_4 = arith.constant 0 : index
    %2 = vector.load %arg0[%c0_3, %c0_4] : memref<64x32xf32, #tpu.memory_space<vmem>>, vector<64x32xf32>
    %cst = arith.constant dense<0.000000e+00> : vector<64x128xf32>
    %3 = tpu.matmul %2, %0, %cst {dimension_numbers = #tpu.dot_dimension_numbers<[1], [0], [0], [1], [0, 0, 1, 1], [], []>} : vector<64x32xf32>, vector<32x128xf32>, vector<64x128xf32> -> vector<64x128xf32>
    %4 = vector.broadcast %1 : vector<1x128xf32> to vector<64x128xf32>
    %5 = arith.addf %3, %4 : vector<64x128xf32>
    %c32 = arith.constant 32 : index
    %c0_5 = arith.constant 0 : index
    %6 = vector.load %arg1[%c32, %c0_5] : memref<64x128xf32, #tpu.memory_space<vmem>>, vector<32x128xf32>
    %7 = tpu.iota {dimensions = array<i32: 1>} : vector<8x128xi32>
    %c64_i32 = arith.constant 64 : i32
    %8 = vector.broadcast %c64_i32 : i32 to vector<8x128xi32>
    %9 = arith.cmpi sge, %7, %8 : vector<8x128xi32>
    %c96_i32 = arith.constant 96 : i32
    %10 = vector.broadcast %c96_i32 : i32 to vector<8x128xi32>
    %11 = arith.cmpi slt, %7, %10 : vector<8x128xi32>
    %12 = arith.andi %9, %11 : vector<8x128xi1>
    %cst_6 = arith.constant 1.000000e+00 : f32
    %cst_7 = arith.constant 5.000000e-01 : f32
    %13 = vector.broadcast %cst_6 : f32 to vector<8x128xf32>
    %14 = vector.broadcast %cst_7 : f32 to vector<8x128xf32>
    %15 = arith.select %12, %13, %14 : vector<8x128xi1>, vector<8x128xf32>
    %cst_8 = arith.constant 0.000000e+00 : f32
    %cst_9 = arith.constant 5.000000e-01 : f32
    %16 = vector.broadcast %cst_8 : f32 to vector<8x128xf32>
    %17 = vector.broadcast %cst_9 : f32 to vector<8x128xf32>
    %18 = arith.select %12, %16, %17 : vector<8x128xi1>, vector<8x128xf32>
    %cst_10 = arith.constant 0.000000e+00 : f32
    %19 = vector.broadcast %cst_10 : f32 to vector<8x32xf32>
    %cst_11 = arith.constant 0.000000e+00 : f32
    %20 = vector.broadcast %cst_11 : f32 to vector<8x32xf32>
    %21 = vector.extract_strided_slice %5 {offsets = [0, 0], sizes = [8, 128], strides = [1, 1]} : vector<64x128xf32> to vector<8x128xf32>
    %cst_12 = arith.constant dense<0.000000e+00> : vector<8x128xf32>
    %22 = tpu.matmul %19, %6, %cst_12 {dimension_numbers = #tpu.dot_dimension_numbers<[1], [0], [0], [1], [0, 0, 1, 1], [], []>} : vector<8x32xf32>, vector<32x128xf32>, vector<8x128xf32> -> vector<8x128xf32>
    %23 = arith.addf %21, %22 : vector<8x128xf32>
    %24 = arith.mulf %23, %15 : vector<8x128xf32>
    %25 = math.tanh %24 : vector<8x128xf32>
    %26 = arith.mulf %25, %15 : vector<8x128xf32>
    %27 = arith.addf %26, %18 : vector<8x128xf32>
    %28 = vector.extract_strided_slice %27 {offsets = [0, 0], sizes = [8, 32], strides = [1, 1]} : vector<8x128xf32> to vector<8x32xf32>
    %29 = vector.extract_strided_slice %27 {offsets = [0, 32], sizes = [8, 32], strides = [1, 1]} : vector<8x128xf32> to vector<8x32xf32>
    %30 = vector.extract_strided_slice %27 {offsets = [0, 64], sizes = [8, 32], strides = [1, 1]} : vector<8x128xf32> to vector<8x32xf32>
    %31 = vector.extract_strided_slice %27 {offsets = [0, 96], sizes = [8, 32], strides = [1, 1]} : vector<8x128xf32> to vector<8x32xf32>
    %32 = arith.mulf %29, %20 : vector<8x32xf32>
    %33 = arith.mulf %28, %30 : vector<8x32xf32>
    %34 = arith.addf %32, %33 : vector<8x32xf32>
    %35 = math.tanh %34 : vector<8x32xf32>
    %36 = arith.mulf %31, %35 : vector<8x32xf32>
    %37 = vector.extract_strided_slice %5 {offsets = [8, 0], sizes = [8, 128], strides = [1, 1]} : vector<64x128xf32> to vector<8x128xf32>
    %cst_13 = arith.constant dense<0.000000e+00> : vector<8x128xf32>
    %38 = tpu.matmul %36, %6, %cst_13 {dimension_numbers = #tpu.dot_dimension_numbers<[1], [0], [0], [1], [0, 0, 1, 1], [], []>} : vector<8x32xf32>, vector<32x128xf32>, vector<8x128xf32> -> vector<8x128xf32>
    %39 = arith.addf %37, %38 : vector<8x128xf32>
    %40 = arith.mulf %39, %15 : vector<8x128xf32>
    %41 = math.tanh %40 : vector<8x128xf32>
    %42 = arith.mulf %41, %15 : vector<8x128xf32>
    %43 = arith.addf %42, %18 : vector<8x128xf32>
    %44 = vector.extract_strided_slice %43 {offsets = [0, 0], sizes = [8, 32], strides = [1, 1]} : vector<8x128xf32> to vector<8x32xf32>
    %45 = vector.extract_strided_slice %43 {offsets = [0, 32], sizes = [8, 32], strides = [1, 1]} : vector<8x128xf32> to vector<8x32xf32>
    %46 = vector.extract_strided_slice %43 {offsets = [0, 64], sizes = [8, 32], strides = [1, 1]} : vector<8x128xf32> to vector<8x32xf32>
    %47 = vector.extract_strided_slice %43 {offsets = [0, 96], sizes = [8, 32], strides = [1, 1]} : vector<8x128xf32> to vector<8x32xf32>
    %48 = arith.mulf %45, %34 : vector<8x32xf32>
    %49 = arith.mulf %44, %46 : vector<8x32xf32>
    %50 = arith.addf %48, %49 : vector<8x32xf32>
    %51 = math.tanh %50 : vector<8x32xf32>
    %52 = arith.mulf %47, %51 : vector<8x32xf32>
    %53 = vector.extract_strided_slice %5 {offsets = [16, 0], sizes = [8, 128], strides = [1, 1]} : vector<64x128xf32> to vector<8x128xf32>
    %cst_14 = arith.constant dense<0.000000e+00> : vector<8x128xf32>
    %54 = tpu.matmul %52, %6, %cst_14 {dimension_numbers = #tpu.dot_dimension_numbers<[1], [0], [0], [1], [0, 0, 1, 1], [], []>} : vector<8x32xf32>, vector<32x128xf32>, vector<8x128xf32> -> vector<8x128xf32>
    %55 = arith.addf %53, %54 : vector<8x128xf32>
    %56 = arith.mulf %55, %15 : vector<8x128xf32>
    %57 = math.tanh %56 : vector<8x128xf32>
    %58 = arith.mulf %57, %15 : vector<8x128xf32>
    %59 = arith.addf %58, %18 : vector<8x128xf32>
    %60 = vector.extract_strided_slice %59 {offsets = [0, 0], sizes = [8, 32], strides = [1, 1]} : vector<8x128xf32> to vector<8x32xf32>
    %61 = vector.extract_strided_slice %59 {offsets = [0, 32], sizes = [8, 32], strides = [1, 1]} : vector<8x128xf32> to vector<8x32xf32>
    %62 = vector.extract_strided_slice %59 {offsets = [0, 64], sizes = [8, 32], strides = [1, 1]} : vector<8x128xf32> to vector<8x32xf32>
    %63 = vector.extract_strided_slice %59 {offsets = [0, 96], sizes = [8, 32], strides = [1, 1]} : vector<8x128xf32> to vector<8x32xf32>
    %64 = arith.mulf %61, %50 : vector<8x32xf32>
    %65 = arith.mulf %60, %62 : vector<8x32xf32>
    %66 = arith.addf %64, %65 : vector<8x32xf32>
    %67 = math.tanh %66 : vector<8x32xf32>
    %68 = arith.mulf %63, %67 : vector<8x32xf32>
    %69 = vector.extract_strided_slice %5 {offsets = [24, 0], sizes = [8, 128], strides = [1, 1]} : vector<64x128xf32> to vector<8x128xf32>
    %cst_15 = arith.constant dense<0.000000e+00> : vector<8x128xf32>
    %70 = tpu.matmul %68, %6, %cst_15 {dimension_numbers = #tpu.dot_dimension_numbers<[1], [0], [0], [1], [0, 0, 1, 1], [], []>} : vector<8x32xf32>, vector<32x128xf32>, vector<8x128xf32> -> vector<8x128xf32>
    %71 = arith.addf %69, %70 : vector<8x128xf32>
    %72 = arith.mulf %71, %15 : vector<8x128xf32>
    %73 = math.tanh %72 : vector<8x128xf32>
    %74 = arith.mulf %73, %15 : vector<8x128xf32>
    %75 = arith.addf %74, %18 : vector<8x128xf32>
    %76 = vector.extract_strided_slice %75 {offsets = [0, 0], sizes = [8, 32], strides = [1, 1]} : vector<8x128xf32> to vector<8x32xf32>
    %77 = vector.extract_strided_slice %75 {offsets = [0, 32], sizes = [8, 32], strides = [1, 1]} : vector<8x128xf32> to vector<8x32xf32>
    %78 = vector.extract_strided_slice %75 {offsets = [0, 64], sizes = [8, 32], strides = [1, 1]} : vector<8x128xf32> to vector<8x32xf32>
    %79 = vector.extract_strided_slice %75 {offsets = [0, 96], sizes = [8, 32], strides = [1, 1]} : vector<8x128xf32> to vector<8x32xf32>
    %80 = arith.mulf %77, %66 : vector<8x32xf32>
    %81 = arith.mulf %76, %78 : vector<8x32xf32>
    %82 = arith.addf %80, %81 : vector<8x32xf32>
    %83 = math.tanh %82 : vector<8x32xf32>
    %84 = arith.mulf %79, %83 : vector<8x32xf32>
    %85 = vector.extract_strided_slice %5 {offsets = [32, 0], sizes = [8, 128], strides = [1, 1]} : vector<64x128xf32> to vector<8x128xf32>
    %cst_16 = arith.constant dense<0.000000e+00> : vector<8x128xf32>
    %86 = tpu.matmul %84, %6, %cst_16 {dimension_numbers = #tpu.dot_dimension_numbers<[1], [0], [0], [1], [0, 0, 1, 1], [], []>} : vector<8x32xf32>, vector<32x128xf32>, vector<8x128xf32> -> vector<8x128xf32>
    %87 = arith.addf %85, %86 : vector<8x128xf32>
    %88 = arith.mulf %87, %15 : vector<8x128xf32>
    %89 = math.tanh %88 : vector<8x128xf32>
    %90 = arith.mulf %89, %15 : vector<8x128xf32>
    %91 = arith.addf %90, %18 : vector<8x128xf32>
    %92 = vector.extract_strided_slice %91 {offsets = [0, 0], sizes = [8, 32], strides = [1, 1]} : vector<8x128xf32> to vector<8x32xf32>
    %93 = vector.extract_strided_slice %91 {offsets = [0, 32], sizes = [8, 32], strides = [1, 1]} : vector<8x128xf32> to vector<8x32xf32>
    %94 = vector.extract_strided_slice %91 {offsets = [0, 64], sizes = [8, 32], strides = [1, 1]} : vector<8x128xf32> to vector<8x32xf32>
    %95 = vector.extract_strided_slice %91 {offsets = [0, 96], sizes = [8, 32], strides = [1, 1]} : vector<8x128xf32> to vector<8x32xf32>
    %96 = arith.mulf %93, %82 : vector<8x32xf32>
    %97 = arith.mulf %92, %94 : vector<8x32xf32>
    %98 = arith.addf %96, %97 : vector<8x32xf32>
    %99 = math.tanh %98 : vector<8x32xf32>
    %100 = arith.mulf %95, %99 : vector<8x32xf32>
    %101 = vector.extract_strided_slice %5 {offsets = [40, 0], sizes = [8, 128], strides = [1, 1]} : vector<64x128xf32> to vector<8x128xf32>
    %cst_17 = arith.constant dense<0.000000e+00> : vector<8x128xf32>
    %102 = tpu.matmul %100, %6, %cst_17 {dimension_numbers = #tpu.dot_dimension_numbers<[1], [0], [0], [1], [0, 0, 1, 1], [], []>} : vector<8x32xf32>, vector<32x128xf32>, vector<8x128xf32> -> vector<8x128xf32>
    %103 = arith.addf %101, %102 : vector<8x128xf32>
    %104 = arith.mulf %103, %15 : vector<8x128xf32>
    %105 = math.tanh %104 : vector<8x128xf32>
    %106 = arith.mulf %105, %15 : vector<8x128xf32>
    %107 = arith.addf %106, %18 : vector<8x128xf32>
    %108 = vector.extract_strided_slice %107 {offsets = [0, 0], sizes = [8, 32], strides = [1, 1]} : vector<8x128xf32> to vector<8x32xf32>
    %109 = vector.extract_strided_slice %107 {offsets = [0, 32], sizes = [8, 32], strides = [1, 1]} : vector<8x128xf32> to vector<8x32xf32>
    %110 = vector.extract_strided_slice %107 {offsets = [0, 64], sizes = [8, 32], strides = [1, 1]} : vector<8x128xf32> to vector<8x32xf32>
    %111 = vector.extract_strided_slice %107 {offsets = [0, 96], sizes = [8, 32], strides = [1, 1]} : vector<8x128xf32> to vector<8x32xf32>
    %112 = arith.mulf %109, %98 : vector<8x32xf32>
    %113 = arith.mulf %108, %110 : vector<8x32xf32>
    %114 = arith.addf %112, %113 : vector<8x32xf32>
    %115 = math.tanh %114 : vector<8x32xf32>
    %116 = arith.mulf %111, %115 : vector<8x32xf32>
    %117 = vector.extract_strided_slice %5 {offsets = [48, 0], sizes = [8, 128], strides = [1, 1]} : vector<64x128xf32> to vector<8x128xf32>
    %cst_18 = arith.constant dense<0.000000e+00> : vector<8x128xf32>
    %118 = tpu.matmul %116, %6, %cst_18 {dimension_numbers = #tpu.dot_dimension_numbers<[1], [0], [0], [1], [0, 0, 1, 1], [], []>} : vector<8x32xf32>, vector<32x128xf32>, vector<8x128xf32> -> vector<8x128xf32>
    %119 = arith.addf %117, %118 : vector<8x128xf32>
    %120 = arith.mulf %119, %15 : vector<8x128xf32>
    %121 = math.tanh %120 : vector<8x128xf32>
    %122 = arith.mulf %121, %15 : vector<8x128xf32>
    %123 = arith.addf %122, %18 : vector<8x128xf32>
    %124 = vector.extract_strided_slice %123 {offsets = [0, 0], sizes = [8, 32], strides = [1, 1]} : vector<8x128xf32> to vector<8x32xf32>
    %125 = vector.extract_strided_slice %123 {offsets = [0, 32], sizes = [8, 32], strides = [1, 1]} : vector<8x128xf32> to vector<8x32xf32>
    %126 = vector.extract_strided_slice %123 {offsets = [0, 64], sizes = [8, 32], strides = [1, 1]} : vector<8x128xf32> to vector<8x32xf32>
    %127 = vector.extract_strided_slice %123 {offsets = [0, 96], sizes = [8, 32], strides = [1, 1]} : vector<8x128xf32> to vector<8x32xf32>
    %128 = arith.mulf %125, %114 : vector<8x32xf32>
    %129 = arith.mulf %124, %126 : vector<8x32xf32>
    %130 = arith.addf %128, %129 : vector<8x32xf32>
    %131 = math.tanh %130 : vector<8x32xf32>
    %132 = arith.mulf %127, %131 : vector<8x32xf32>
    %133 = vector.extract_strided_slice %5 {offsets = [56, 0], sizes = [8, 128], strides = [1, 1]} : vector<64x128xf32> to vector<8x128xf32>
    %cst_19 = arith.constant dense<0.000000e+00> : vector<8x128xf32>
    %134 = tpu.matmul %132, %6, %cst_19 {dimension_numbers = #tpu.dot_dimension_numbers<[1], [0], [0], [1], [0, 0, 1, 1], [], []>} : vector<8x32xf32>, vector<32x128xf32>, vector<8x128xf32> -> vector<8x128xf32>
    %135 = arith.addf %133, %134 : vector<8x128xf32>
    %136 = arith.mulf %135, %15 : vector<8x128xf32>
    %137 = math.tanh %136 : vector<8x128xf32>
    %138 = arith.mulf %137, %15 : vector<8x128xf32>
    %139 = arith.addf %138, %18 : vector<8x128xf32>
    %140 = vector.extract_strided_slice %139 {offsets = [0, 0], sizes = [8, 32], strides = [1, 1]} : vector<8x128xf32> to vector<8x32xf32>
    %141 = vector.extract_strided_slice %139 {offsets = [0, 32], sizes = [8, 32], strides = [1, 1]} : vector<8x128xf32> to vector<8x32xf32>
    %142 = vector.extract_strided_slice %139 {offsets = [0, 64], sizes = [8, 32], strides = [1, 1]} : vector<8x128xf32> to vector<8x32xf32>
    %143 = vector.extract_strided_slice %139 {offsets = [0, 96], sizes = [8, 32], strides = [1, 1]} : vector<8x128xf32> to vector<8x32xf32>
    %144 = arith.mulf %141, %130 : vector<8x32xf32>
    %145 = arith.mulf %140, %142 : vector<8x32xf32>
    %146 = arith.addf %144, %145 : vector<8x32xf32>
    %147 = math.tanh %146 : vector<8x32xf32>
    %148 = arith.mulf %143, %147 : vector<8x32xf32>
    %149 = tpu.concatenate %36, %52, %68, %84, %100, %116, %132, %148 in 0 : vector<8x32xf32>, vector<8x32xf32>, vector<8x32xf32>, vector<8x32xf32>, vector<8x32xf32>, vector<8x32xf32>, vector<8x32xf32>, vector<8x32xf32> -> vector<64x32xf32>
    %c0_20 = arith.constant 0 : index
    %c0_21 = arith.constant 0 : index
    %150 = vector.load %arg3[%c0_20, %c0_21] : memref<48x64xf32, #tpu.memory_space<vmem>>, vector<32x16xf32>
    %c1 = arith.constant 1 : index
    %c0_22 = arith.constant 0 : index
    %151 = vector.load %arg2[%c1, %c0_22] : memref<3x128xf32, #tpu.memory_space<vmem>>, vector<1x16xf32>
    %c32_23 = arith.constant 32 : index
    %c0_24 = arith.constant 0 : index
    %152 = vector.load %arg3[%c32_23, %c0_24] : memref<48x64xf32, #tpu.memory_space<vmem>>, vector<16x64xf32>
    %c2 = arith.constant 2 : index
    %c0_25 = arith.constant 0 : index
    %153 = vector.load %arg2[%c2, %c0_25] : memref<3x128xf32, #tpu.memory_space<vmem>>, vector<1x64xf32>
    %cst_26 = arith.constant dense<0.000000e+00> : vector<64x16xf32>
    %154 = tpu.matmul %149, %150, %cst_26 {dimension_numbers = #tpu.dot_dimension_numbers<[1], [0], [0], [1], [0, 0, 1, 1], [], []>} : vector<64x32xf32>, vector<32x16xf32>, vector<64x16xf32> -> vector<64x16xf32>
    %155 = vector.broadcast %151 : vector<1x16xf32> to vector<64x16xf32>
    %156 = arith.addf %154, %155 : vector<64x16xf32>
    %cst_27 = arith.constant 0.000000e+00 : f32
    %157 = vector.broadcast %cst_27 : f32 to vector<64x16xf32>
    %158 = arith.maximumf %156, %157 : vector<64x16xf32>
    %cst_28 = arith.constant dense<0.000000e+00> : vector<64x64xf32>
    %159 = tpu.matmul %158, %152, %cst_28 {dimension_numbers = #tpu.dot_dimension_numbers<[1], [0], [0], [1], [0, 0, 1, 1], [], []>} : vector<64x16xf32>, vector<16x64xf32>, vector<64x64xf32> -> vector<64x64xf32>
    %160 = vector.broadcast %153 : vector<1x64xf32> to vector<64x64xf32>
    %161 = arith.addf %159, %160 : vector<64x64xf32>
    %c0_29 = arith.constant 0 : index
    %c0_30 = arith.constant 0 : index
    %162 = vector.load %arg4[%c0_29, %c0_30] : memref<64x64xf32, #tpu.memory_space<vmem>>, vector<64x64xf32>
    tpu.vector_store %arg4[%c0_29, %c0_30], %161 {strides = array<i32>} : memref<64x64xf32, #tpu.memory_space<vmem>>, vector<64x64xf32>,
    return
  }
}

</mosaic_0001>

<bundles_post_ra>
// kernel: lstmae_decoder_forward.1
= control target key start
LH: loop header
LB: loop body
LE: loop exit
PB: predicated region body
PF: predicated region fallthrough
CT: control target
= control target key end

     0   :  { %v1584_v2 = vmov 0.0|0.0   ;;  %vm34_vm0 = vcmask 261120   ;;  %vm1585_vm1 = vmmov 0   ;;  %v1586_v4 = vmov 0.0   ;;  %s1588_s10 = smov 64   ;;  %s1589_s11 = smov 32   ;;  %s1918_s1 = inlined_call_operand.vmem [shape: f32[64,128], index: 1, kind: input, shape index: {}]   ;;  %s1919_s0 = inlined_call_operand.vmem [shape: f32[64,32], index: 0, kind: input, shape index: {}]   ;;  %s1920_s2 = inlined_call_operand.vmem [shape: f32[3,128], index: 2, kind: input, shape index: {}]   ;;  %s1921_s3 = inlined_call_operand.vmem [shape: f32[48,64], index: 3, kind: input, shape index: {}]   ;;  %s1922_s4 = inlined_call_operand.vmem [shape: f32[64,64], index: 4, kind: output, shape index: {}]  }
   0x1   :  { %v17_v0 = vld [vmem:[%s1918_s1] sm:$0xff]  ;;  %v18_v1 = vld [vmem:[%s1918_s1 + $0x8] sm:$0xff]  ;;  %1486 = vmatprep.subr.bf16.mxu1 %v1584_v2  ;;  %1362 = vmatprep.mubr.msk.f32.mxu1 %vm1585_vm1, %v1586_v4  ;;  %v19_v7 = vld [vmem:[%s1918_s1 + $0x10] sm:$0xff]  ;;  %v168_v16 = vlaneseq  ;;  %v1587_v24 = vmov 0.5   ;;  %vm1083_vm5 = vcmask 130048   ;;  %vm1213_vm6 = vcmask 523264  }
   0x2   :  { %v164_v3 = vld [vmem:[%s1918_s1 + $0x20] sm:$0xff]  ;;  %v1478_v5 = vpack.c.bf16 %v18_v1, %v17_v0  ;;  %v165_v6 = vld [vmem:[%s1918_s1 + $0x28] sm:$0xff]  ;;  %v20_v8 = vld [vmem:[%s1918_s1 + $0x18] sm:$0xff] }
   0x3   :  { %v1636_v9 = vpack.c.bf16 %v165_v6, %v164_v3  ;;  %v1482_v10 = vpack.c.bf16 %v20_v8, %v19_v7  ;;  %v22_v11 = vld [vmem:[%s1919_s0] sm:$0xff]  ;;  %v166_v12 = vld [vmem:[%s1918_s1 + $0x30] sm:$0xff]  ;;  %v167_v13 = vld [vmem:[%s1918_s1 + $0x38] sm:$0xff]  ;;  %v169_v17 = vand.u32 127, %v168_v16 }
   0x4   :  { %1479 = vmatprep.subr.bf16.mxu0 %v1478_v5  ;;  %1342 = vmatprep.mubr.msk.f32.mxu0 %vm34_vm0, %v22_v11  ;;  %v1649_v14 = vpack.c.bf16 %v167_v13, %v166_v12  ;;  %v23_v15 = vld [vmem:[%s1919_s0 + $0x8] sm:$0xff]  ;;  %v1673_v18 = vld [vmem:[%s1920_s2] ss:$0 sm:$0xff]  ;;  %v24_v54 = vld [vmem:[%s1919_s0 + $0x10] sm:$0xff] }
   0x5   :  { %1481 = vmatpush3.bf16.msra.mxu0 %v1478_v5  ;;  %1488 = vmatpush3.bf16.msra.mxu1 %v1636_v9  ;;  %vm170_vm2 = vcmp.ge.s32.totalorder %v169_v17, 64  ;;  %vm171_vm3 = vcmp.lt.s32.totalorder %v169_v17, 96  ;;  %v25_v55 = vld [vmem:[%s1919_s0 + $0x18] sm:$0xff]  ;;  %v26_v56 = vld [vmem:[%s1919_s0 + $0x20] sm:$0xff]  ;;  %v27_v57 = vld [vmem:[%s1919_s0 + $0x28] sm:$0xff] }
   0x6   :  { %1483 = vmatprep.subr.bf16.mxu0 %v1482_v10  ;;  %1489 = vmatprep.subr.bf16.mxu1 %v1584_v2  ;;  %vm172_vm4 = vmand %vm170_vm2, %vm171_vm3  ;;  %v28_v58 = vld [vmem:[%s1919_s0 + $0x30] sm:$0xff]  ;;  %v29_v59 = vld [vmem:[%s1919_s0 + $0x38] sm:$0xff] }
   0x7   :  { %v1676_v25 = vsel %vm172_vm4, 1.0, %v1587_v24  ;;  %v1679_v29 = vsel %vm172_vm4, 0.0, %v1587_v24 }
   0x9   :  { %1485 = vmatpush3.bf16.msra.mxu0 %v1482_v10  ;;  %1491 = vmatpush3.bf16.msra.mxu1 %v1649_v14 }
   0xa   :  { %1492 = vmatprep.subr.bf16.mxu1 %v1584_v2  ;;  %1498 = vmatprep.subr.bf16.mxu0 %v1584_v2 }
   0xc   :  { %1343 = vmatmul.mubr.msk.f32.vlgmr.msra.gmra.mrb[0].mxu0 %vm34_vm0, %v23_v15  ;;  %1363 = vmatmul.mubr.f32.vlgmr.msra.gmra.mrb[0].mxu1 %v1586_v4 }
   0xd   :  { %1494 = vmatpush3.bf16.msra.mxu1 %v1636_v9  ;;  %1373 = vmatprep.mubr.msk.f32.mxu1 %vm1585_vm1, %v1586_v4 }
   0xe   :  { %1495 = vmatprep.subr.bf16.mxu1 %v1584_v2  ;;  %1500 = vmatpush3.bf16.msra.mxu0 %v1636_v9 }
   0xf   :  { %1501 = vmatprep.subr.bf16.mxu0 %v1584_v2  ;;  %1345 = vmatprep.mubr.msk.f32.mxu0 %vm34_vm0, %v24_v54 }
  0x10   :  { %1346 = vmatmul.mubr.msk.f32.gmra.mrb[2].mxu0 %vm34_vm0, %v25_v55 }
  0x11   :  { %1497 = vmatpush3.bf16.msra.mxu1 %v1649_v14  ;;  %1348 = vmatprep.mubr.msk.f32.mxu0 %vm34_vm0, %v26_v56 }
  0x12   :  { %1503 = vmatpush3.bf16.msra.mxu0 %v1649_v14  ;;  %1504 = vmatprep.subr.bf16.mxu1 %v1584_v2 }
  0x13   :  { %1510 = vmatprep.subr.bf16.mxu0 %v1584_v2 }
  0x14   :  { %1349 = vmatmul.mubr.msk.f32.gmra.mrb[4].mxu0 %vm34_vm0, %v27_v57 }
  0x15   :  { %1351 = vmatprep.mubr.msk.f32.mxu0 %vm34_vm0, %v28_v58 }
  0x18   :  { %1352 = vmatmul.mubr.msk.f32.gmra.mrb[6].mxu0 %vm34_vm0, %v29_v59 }
  0x19   :  { %1384 = vmatprep.mubr.msk.f32.mxu0 %vm1585_vm1, %v1586_v4 }
  0xdf   :  { %v1344_v19 = vpop.f32.mrb[0].mxu0  ;;  %v244_v20 = vpop.f32.mrb[0].mxu1 }
  0xe0   :  { %v125_v21 = vpop.f32.mrb[1].mxu0  ;;  %v1364_v22 = vpop.f32.mrb[1].mxu1  ;;  %v131_v41 = vadd.f32 %v1344_v19, %v1673_v18 }
  0xe1   :  { %v126_v23 = vadd.f32 %v1673_v18, %v125_v21 }
  0xe3   :  { %v248_v26 = vadd.f32 %v244_v20, %v126_v23  ;;  %v1347_v63 = vpop.f32.mrb[2].mxu0 }
  0xe4   :  { %v135_v0 = vpop.f32.mrb[3].mxu0 }
  0xe5   :  { %v249_v27 = vmul.f32 %v248_v26, %v1676_v25  ;;  %v136_v8 = vadd.f32 %v1673_v18, %v135_v0 }
  0xe7   :  { %1552 = vtanh.f32 %v249_v27  ;;  %v1731_v1 = vpop.f32.mrb[4].mxu0 }
  0xe8   :  { %v1733_v3 = vpop.f32.mrb[5].mxu0 }
  0xeb   :  { %v1735_v5 = vpop.f32.mrb[6].mxu0 }
  0xec   :  { %v1737_v6 = vpop.f32.mrb[7].mxu0 }
  0xf1   :  { %v1553_v28 = vpop.eup %1552 }
  0xf2   :  { %v251_v30 = vmul.f32 %v1553_v28, %v1676_v25 }
  0xf4   :  { %v252_v31 = vadd.f32 %v251_v30, %v1679_v29  ;;  %v141_v30 = vadd.f32 %v1347_v63, %v1673_v18 }
  0xf6   :  { %255 = vrot.lane.b32.xlu0 %v252_v31, %s1588_s10  ;;  %v253_v34 = vmul.f32 0.0, %v252_v31 }
 0x168   :  { %v256_v32 = vpop.permute.xlu0 %255 }
 0x169   :  { %v258_v33 = vmul.f32 %v256_v32, %v252_v31 }
 0x16b   :  { %260 = vrot.lane.b32.xlu0 %v258_v33, %s1589_s11 }
 0x1dd   :  { %v261_v35 = vpop.permute.xlu0 %260 }
 0x1de   :  { %v263_v36 = vadd.f32 %v261_v35, %v253_v34 }
 0x1e0   :  { %1554 = vtanh.f32 %v263_v36 }
 0x1ea   :  { %v1555_v37 = vpop.eup %1554 }
 0x1eb   :  { %266 = vrot.lane.b32.xlu1 %v1555_v37, %s1588_s10 }
 0x25d   :  { %v267_v38 = vpop.permute.xlu1 %266 }
 0x25e   :  { %v269_v39 = vmul.f32 %v267_v38, %v252_v31 }
 0x260   :  { %271 = vrot.lane.b32.xlu1 %v269_v39, %s1589_s11 }
 0x2d2   :  { %v1687_v40 = vpop.permute.xlu1 %271 }
 0x2d3   :  { %1374 = vmatmul.mubr.msk.f32.vlgmr.msra.gmra.mrb[2].mxu1 %vm34_vm0, %v1687_v40 }
 0x2d4   :  { %1506 = vmatpush3.bf16.msra.mxu1 %v1636_v9  ;;  %1395 = vmatprep.mubr.msk.f32.mxu1 %vm1585_vm1, %v1586_v4 }
 0x2d5   :  { %1507 = vmatprep.subr.bf16.mxu1 %v1584_v2 }
 0x2d8   :  { %1509 = vmatpush3.bf16.msra.mxu1 %v1649_v14 }
 0x2d9   :  { %1516 = vmatprep.subr.bf16.mxu1 %v1584_v2 }
 0x3a6   :  { %v341_v42 = vpop.f32.mrb[2].mxu1 }
 0x3a7   :  { %v345_v43 = vadd.f32 %v341_v42, %v131_v41  ;;  %v1375_v44 = vpop.f32.mrb[3].mxu1 }
 0x3a9   :  { %v346_v45 = vmul.f32 %v345_v43, %v1676_v25 }
 0x3ab   :  { %1556 = vtanh.f32 %v346_v45 }
 0x3b5   :  { %v1557_v46 = vpop.eup %1556 }
 0x3b6   :  { %v348_v47 = vmul.f32 %v1557_v46, %v1676_v25 }
 0x3b8   :  { %v349_v48 = vadd.f32 %v348_v47, %v1679_v29 }
 0x3ba   :  { %352 = vrot.lane.b32.xlu0 %v349_v48, %s1588_s10  ;;  %v350_v51 = vmul.f32 %v349_v48, %v263_v36 }
 0x42c   :  { %v353_v49 = vpop.permute.xlu0 %352 }
 0x42d   :  { %v355_v50 = vmul.f32 %v353_v49, %v349_v48 }
 0x42f   :  { %357 = vrot.lane.b32.xlu1 %v355_v50, %s1589_s11 }
 0x4a1   :  { %v358_v52 = vpop.permute.xlu1 %357 }
 0x4a2   :  { %v360_v53 = vadd.f32 %v358_v52, %v350_v51 }
 0x4a4   :  { %1558 = vtanh.f32 %v360_v53 }
 0x4ae   :  { %v1559_v60 = vpop.eup %1558 }
 0x4af   :  { %363 = vrot.lane.b32.xlu0 %v1559_v60, %s1588_s10 }
 0x521   :  { %v364_v61 = vpop.permute.xlu0 %363 }
 0x522   :  { %v366_v62 = vmul.f32 %v364_v61, %v349_v48  ;;  %v146_v48 = vadd.f32 %v1673_v18, %v1733_v3  ;;  %v151_v3 = vadd.f32 %v1731_v1, %v1673_v18 }
 0x524   :  { %368 = vrot.lane.b32.xlu1 %v366_v62, %s1589_s11 }
 0x596   :  { %v1739_v7 = vpop.permute.xlu1 %368 }
 0x597   :  { %1385 = vmatmul.mubr.msk.f32.vlgmr.msra.gmra.mrb[8].mxu0 %vm34_vm0, %v1739_v7 }
 0x598   :  { %1512 = vmatpush3.bf16.msra.mxu0 %v1636_v9  ;;  %1406 = vmatprep.mubr.msk.f32.mxu0 %vm1585_vm1, %v1586_v4 }
 0x599   :  { %1513 = vmatprep.subr.bf16.mxu0 %v1584_v2 }
 0x59c   :  { %1515 = vmatpush3.bf16.msra.mxu0 %v1649_v14 }
 0x59d   :  { %1522 = vmatprep.subr.bf16.mxu0 %v1584_v2 }
 0x66a   :  { %v438_v10 = vpop.f32.mrb[8].mxu0 }
 0x66b   :  { %v442_v11 = vadd.f32 %v438_v10, %v136_v8  ;;  %v1386_v12 = vpop.f32.mrb[9].mxu0 }
 0x66d   :  { %v443_v13 = vmul.f32 %v442_v11, %v1676_v25 }
 0x66f   :  { %1560 = vtanh.f32 %v443_v13 }
 0x679   :  { %v1561_v15 = vpop.eup %1560 }
 0x67a   :  { %v445_v16 = vmul.f32 %v1561_v15, %v1676_v25 }
 0x67c   :  { %v446_v17 = vadd.f32 %v445_v16, %v1679_v29 }
 0x67e   :  { %449 = vrot.lane.b32.xlu0 %v446_v17, %s1588_s10  ;;  %v447_v21 = vmul.f32 %v446_v17, %v360_v53 }
 0x6f0   :  { %v450_v19 = vpop.permute.xlu0 %449 }
 0x6f1   :  { %v452_v20 = vmul.f32 %v450_v19, %v446_v17  ;;  %v950_v19 = vld [vmem:[%s1921_s3 + $0x8] sm:$0xff] }
 0x6f3   :  { %454 = vrot.lane.b32.xlu1 %v452_v20, %s1589_s11 }
 0x765   :  { %v455_v22 = vpop.permute.xlu1 %454 }
 0x766   :  { %v457_v23 = vadd.f32 %v455_v22, %v447_v21 }
 0x768   :  { %1562 = vtanh.f32 %v457_v23 }
 0x772   :  { %v1563_v24 = vpop.eup %1562 }
 0x773   :  { %460 = vrot.lane.b32.xlu0 %v1563_v24, %s1588_s10  ;;  %v951_v24 = vld [vmem:[%s1921_s3 + $0x10] sm:$0xff] }
 0x7e5   :  { %v461_v26 = vpop.permute.xlu0 %460 }
 0x7e6   :  { %v463_v27 = vmul.f32 %v461_v26, %v446_v17  ;;  %v949_v17 = vld [vmem:[%s1921_s3] sm:$0xff]  ;;  %v952_v26 = vld [vmem:[%s1921_s3 + $0x18] sm:$0xff] }
 0x7e7   :  { %v1534_v20 = vpack.c.bf16 %v950_v19, %v949_v17 }
 0x7e8   :  { %465 = vrot.lane.b32.xlu1 %v463_v27, %s1589_s11  ;;  %v1538_v27 = vpack.c.bf16 %v952_v26, %v951_v24 }
 0x85a   :  { %v1757_v28 = vpop.permute.xlu1 %465 }
 0x85b   :  { %1396 = vmatmul.mubr.msk.f32.vlgmr.msra.gmra.mrb[4].mxu1 %vm34_vm0, %v1757_v28 }
 0x85c   :  { %1518 = vmatpush3.bf16.msra.mxu1 %v1636_v9  ;;  %1417 = vmatprep.mubr.msk.f32.mxu1 %vm1585_vm1, %v1586_v4 }
 0x85d   :  { %1519 = vmatprep.subr.bf16.mxu1 %v1584_v2 }
 0x860   :  { %1521 = vmatpush3.bf16.msra.mxu1 %v1649_v14 }
 0x861   :  { %1528 = vmatprep.subr.bf16.mxu1 %v1584_v2 }
 0x92e   :  { %v535_v31 = vpop.f32.mrb[4].mxu1 }
 0x92f   :  { %v539_v32 = vadd.f32 %v535_v31, %v141_v30  ;;  %v1397_v33 = vpop.f32.mrb[5].mxu1  ;;  %v156_v31 = vadd.f32 %v1673_v18, %v1737_v6 }
 0x931   :  { %v540_v34 = vmul.f32 %v539_v32, %v1676_v25 }
 0x933   :  { %1564 = vtanh.f32 %v540_v34 }
 0x93d   :  { %v1565_v35 = vpop.eup %1564 }
 0x93e   :  { %v542_v36 = vmul.f32 %v1565_v35, %v1676_v25 }
 0x940   :  { %v543_v37 = vadd.f32 %v542_v36, %v1679_v29 }
 0x942   :  { %546 = vrot.lane.b32.xlu0 %v543_v37, %s1588_s10  ;;  %v544_v41 = vmul.f32 %v543_v37, %v457_v23 }
 0x9b4   :  { %v547_v38 = vpop.permute.xlu0 %546 }
 0x9b5   :  { %v549_v39 = vmul.f32 %v547_v38, %v543_v37 }
 0x9b7   :  { %551 = vrot.lane.b32.xlu1 %v549_v39, %s1589_s11 }
 0xa29   :  { %v552_v42 = vpop.permute.xlu1 %551 }
 0xa2a   :  { %v554_v43 = vadd.f32 %v552_v42, %v544_v41 }
 0xa2c   :  { %1566 = vtanh.f32 %v554_v43 }
 0xa36   :  { %v1567_v44 = vpop.eup %1566 }
 0xa37   :  { %557 = vrot.lane.b32.xlu0 %v1567_v44, %s1588_s10 }
 0xaa9   :  { %v558_v45 = vpop.permute.xlu0 %557 }
 0xaaa   :  { %v560_v46 = vmul.f32 %v558_v45, %v543_v37 }
 0xaac   :  { %562 = vrot.lane.b32.xlu1 %v560_v46, %s1589_s11 }
 0xb1e   :  { %v1775_v47 = vpop.permute.xlu1 %562 }
 0xb1f   :  { %1407 = vmatmul.mubr.msk.f32.vlgmr.msra.gmra.mrb[10].mxu0 %vm34_vm0, %v1775_v47 }
 0xb20   :  { %1524 = vmatpush3.bf16.msra.mxu0 %v1636_v9  ;;  %1428 = vmatprep.mubr.msk.f32.mxu0 %vm1585_vm1, %v1586_v4 }
 0xb21   :  { %1525 = vmatprep.subr.bf16.mxu0 %v1584_v2 }
 0xb24   :  { %1527 = vmatpush3.bf16.msra.mxu0 %v1649_v14 }
 0xb25   :  { %1535 = vmatprep.subr.bf16.mxu0 %v1534_v20 }
 0xbf2   :  { %v632_v49 = vpop.f32.mrb[10].mxu0 }
 0xbf3   :  { %v636_v50 = vadd.f32 %v632_v49, %v146_v48  ;;  %v1408_v51 = vpop.f32.mrb[11].mxu0  ;;  %v954_v48 = vld [vmem:[%s1921_s3 + $0x20] sm:$0xff]  ;;  %v955_v49 = vld [vmem:[%s1921_s3 + $0x28] sm:$0xff] }
 0xbf5   :  { %v637_v52 = vmul.f32 %v636_v50, %v1676_v25  ;;  %v1542_v50 = vpack.c.bf16 %v955_v49, %v954_v48 }
 0xbf7   :  { %1568 = vtanh.f32 %v637_v52 }
 0xc01   :  { %v1569_v53 = vpop.eup %1568 }
 0xc02   :  { %v639_v54 = vmul.f32 %v1569_v53, %v1676_v25  ;;  %v1852_v53 = vld [vmem:[%s1920_s2 + $0x1] ss:$0 sm:$0xff] }
 0xc04   :  { %v640_v55 = vadd.f32 %v639_v54, %v1679_v29 }
 0xc06   :  { %643 = vrot.lane.b32.xlu0 %v640_v55, %s1588_s10  ;;  %v641_v58 = vmul.f32 %v640_v55, %v554_v43 }
 0xc78   :  { %v644_v56 = vpop.permute.xlu0 %643 }
 0xc79   :  { %v646_v57 = vmul.f32 %v644_v56, %v640_v55 }
 0xc7b   :  { %648 = vrot.lane.b32.xlu1 %v646_v57, %s1589_s11 }
 0xced   :  { %v649_v59 = vpop.permute.xlu1 %648 }
 0xcee   :  { %v651_v60 = vadd.f32 %v649_v59, %v641_v58 }
 0xcf0   :  { %1570 = vtanh.f32 %v651_v60 }
 0xcfa   :  { %v1571_v61 = vpop.eup %1570 }
 0xcfb   :  { %654 = vrot.lane.b32.xlu0 %v1571_v61, %s1588_s10 }
 0xd6d   :  { %v655_v62 = vpop.permute.xlu0 %654 }
 0xd6e   :  { %v657_v63 = vmul.f32 %v655_v62, %v640_v55 }
 0xd70   :  { %659 = vrot.lane.b32.xlu1 %v657_v63, %s1589_s11 }
 0xde2   :  { %v660_v0 = vpop.permute.xlu1 %659 }
 0xde3   :  { %1418 = vmatmul.mubr.msk.f32.vlgmr.msra.gmra.mrb[6].mxu1 %vm34_vm0, %v660_v0 }
 0xde4   :  { %1530 = vmatpush3.bf16.msra.mxu1 %v1636_v9  ;;  %1439 = vmatprep.mubr.msk.f32.mxu1 %vm1585_vm1, %v1586_v4 }
 0xde5   :  { %1531 = vmatprep.subr.bf16.mxu1 %v1584_v2 }
 0xde8   :  { %1533 = vmatpush3.bf16.msra.mxu1 %v1649_v14 }
 0xde9   :  { %1543 = vmatprep.subr.bf16.mxu1 %v1542_v50 }
 0xeb6   :  { %v729_v8 = vpop.f32.mrb[6].mxu1 }
 0xeb7   :  { %v733_v10 = vadd.f32 %v729_v8, %v151_v3  ;;  %v1419_v11 = vpop.f32.mrb[7].mxu1 }
 0xeb9   :  { %v734_v12 = vmul.f32 %v733_v10, %v1676_v25  ;;  %v161_v10 = vadd.f32 %v1735_v5, %v1673_v18 }
 0xebb   :  { %1572 = vtanh.f32 %v734_v12 }
 0xec5   :  { %v1573_v13 = vpop.eup %1572 }
 0xec6   :  { %v736_v15 = vmul.f32 %v1573_v13, %v1676_v25 }
 0xec8   :  { %v737_v9 = vadd.f32 %v736_v15, %v1679_v29  ;;  %v1251_v15 = vld [vmem:[%s1920_s2 + $0x2] ss:$0 sm:$0xff] }
 0xeca   :  { %740 = vrot.lane.b32.xlu0 %v737_v9, %s1588_s10  ;;  %v738_v14 = vmul.f32 %v737_v9, %v651_v60 }
 0xf3c   :  { %v741_v4 = vpop.permute.xlu0 %740 }
 0xf3d   :  { %v743_v2 = vmul.f32 %v741_v4, %v737_v9 }
 0xf3f   :  { %745 = vrot.lane.b32.xlu1 %v743_v2, %s1589_s11 }
 0xfb1   :  { %v746_v16 = vpop.permute.xlu1 %745 }
 0xfb2   :  { %v748_v1 = vadd.f32 %v746_v16, %v738_v14 }
 0xfb4   :  { %1574 = vtanh.f32 %v748_v1 }
 0xfbe   :  { %v1575_v21 = vpop.eup %1574 }
 0xfbf   :  { %751 = vrot.lane.b32.xlu0 %v1575_v21, %s1588_s10 }
0x1031   :  { %v752_v22 = vpop.permute.xlu0 %751 }
0x1032   :  { %v754_v23 = vmul.f32 %v752_v22, %v737_v9 }
0x1034   :  { %756 = vrot.lane.b32.xlu1 %v754_v23, %s1589_s11 }
0x10a6   :  { %v757_v30 = vpop.permute.xlu1 %756 }
0x10a7   :  { %1429 = vmatmul.mubr.msk.f32.vlgmr.msra.gmra.mrb[12].mxu0 %vm34_vm0, %v757_v30 }
0x10a8   :  { %1537 = vmatpush3.bf16.msra.mxu0 %v1534_v20  ;;  %1450 = vmatprep.mubr.msk.f32.mxu0 %vm34_vm0, %v1687_v40 }
0x10a9   :  { %1539 = vmatprep.subr.bf16.mxu0 %v1538_v27 }
0x10ac   :  { %1541 = vmatpush3.bf16.msra.mxu0 %v1538_v27 }
0x10af   :  { %1451 = vmatmul.mubr.msk.f32.vlgmr.msra.gmra.mrb[14].mxu0 %vm34_vm0, %v1739_v7 }
0x10b0   :  { %1453 = vmatprep.mubr.msk.f32.mxu0 %vm34_vm0, %v1757_v28 }
0x10b3   :  { %1454 = vmatmul.mubr.msk.f32.gmra.mrb[16].mxu0 %vm34_vm0, %v1775_v47 }
0x10b4   :  { %1456 = vmatprep.mubr.msk.f32.mxu0 %vm34_vm0, %v660_v0 }
0x10b7   :  { %1457 = vmatmul.mubr.msk.f32.gmra.mrb[18].mxu0 %vm34_vm0, %v757_v30 }
0x117a   :  { %v826_v32 = vpop.f32.mrb[12].mxu0 }
0x117b   :  { %v830_v40 = vadd.f32 %v826_v32, %v156_v31  ;;  %v1430_v33 = vpop.f32.mrb[13].mxu0 }
0x117d   :  { %v831_v34 = vmul.f32 %v830_v40, %v1676_v25 }
0x117f   :  { %1576 = vtanh.f32 %v831_v34 }
0x1182   :  { %v1452_v7 = vpop.f32.mrb[14].mxu0 }
0x1183   :  { %v1032_v35 = vpop.f32.mrb[15].mxu0  ;;  %v1038_v55 = vadd.f32 %v1452_v7, %v1852_v53 }
0x1184   :  { %v1033_v54 = vadd.f32 %v1852_v53, %v1032_v35 }
0x1185   :  { %v1072_v59 = vmax.f32 %v1038_v55, 0.0 }
0x1186   :  { %v1455_v36 = vpop.f32.mrb[16].mxu0  ;;  %v1071_v56 = vmax.f32 %v1033_v54, 0.0 }
0x1187   :  { %v1042_v28 = vpop.f32.mrb[17].mxu0  ;;  %v1048_v60 = vadd.f32 %v1455_v36, %v1852_v53 }
0x1188   :  { %v1043_v57 = vadd.f32 %v1852_v53, %v1042_v28 }
0x1189   :  { %v1577_v37 = vpop.eup %1576  ;;  %v1074_v63 = vmax.f32 %v1048_v60, 0.0 }
0x118a   :  { %v1458_v38 = vpop.f32.mrb[18].mxu0  ;;  %v833_v39 = vmul.f32 %v1577_v37, %v1676_v25  ;;  %v1073_v61 = vmax.f32 %v1043_v57, 0.0 }
0x118b   :  { %v1052_v41 = vpop.f32.mrb[19].mxu0  ;;  %v1058_v0 = vadd.f32 %v1458_v38, %v1852_v53 }
0x118c   :  { %v834_v42 = vadd.f32 %v833_v39, %v1679_v29  ;;  %v1053_v62 = vadd.f32 %v1852_v53, %v1052_v41 }
0x118d   :  { %v1076_v8 = vmax.f32 %v1058_v0, 0.0 }
0x118e   :  { %837 = vrot.lane.b32.xlu0 %v834_v42, %s1588_s10  ;;  %v835_v44 = vmul.f32 %v834_v42, %v748_v1  ;;  %v1075_v3 = vmax.f32 %v1053_v62, 0.0 }
0x1200   :  { %v838_v6 = vpop.permute.xlu0 %837 }
0x1201   :  { %v840_v43 = vmul.f32 %v838_v6, %v834_v42 }
0x1203   :  { %842 = vrot.lane.b32.xlu1 %v840_v43, %s1589_s11 }
0x1275   :  { %v843_v45 = vpop.permute.xlu1 %842 }
0x1276   :  { %v1838_v46 = vadd.f32 %v843_v45, %v835_v44 }
0x1278   :  { %1578 = vtanh.f32 %v1838_v46 }
0x1282   :  { %v1579_v47 = vpop.eup %1578 }
0x1283   :  { %848 = vrot.lane.b32.xlu0 %v1579_v47, %s1588_s10 }
0x12f5   :  { %v849_v51 = vpop.permute.xlu0 %848 }
0x12f6   :  { %v851_v52 = vmul.f32 %v849_v51, %v834_v42 }
0x12f8   :  { %853 = vrot.lane.b32.xlu1 %v851_v52, %s1589_s11 }
0x136a   :  { %v854_v58 = vpop.permute.xlu1 %853 }
0x136b   :  { %1440 = vmatmul.mubr.msk.f32.vlgmr.msra.gmra.mrb[8].mxu1 %vm34_vm0, %v854_v58  ;;  %1459 = vmatprep.mubr.msk.f32.mxu0 %vm34_vm0, %v854_v58 }
0x136c   :  { %1545 = vmatpush3.bf16.msra.mxu1 %v1542_v50  ;;  %1466 = vmatprep.mubr.msk.f32.mxu1 %vm1083_vm5, %v1071_v56 }
0x136f   :  { %1467 = vmatmul.mubr.msk.f32.vlgmr.msra.gmra.mrb[10].mxu1 %vm1083_vm5, %v1072_v59 }
0x1370   :  { %1469 = vmatprep.mubr.msk.f32.mxu1 %vm1083_vm5, %v1073_v61 }
0x1373   :  { %1470 = vmatmul.mubr.msk.f32.gmra.mrb[12].mxu1 %vm1083_vm5, %v1074_v63 }
0x1374   :  { %1472 = vmatprep.mubr.msk.f32.mxu1 %vm1083_vm5, %v1075_v3 }
0x1377   :  { %1473 = vmatmul.mubr.msk.f32.gmra.mrb[14].mxu1 %vm1083_vm5, %v1076_v8 }
0x143e   :  { %v923_v11 = vpop.f32.mrb[8].mxu1 }
0x143f   :  { %v927_v12 = vadd.f32 %v923_v11, %v161_v10  ;;  %v1441_v13 = vpop.f32.mrb[9].mxu1 }
0x1441   :  { %v928_v9 = vmul.f32 %v927_v12, %v1676_v25 }
0x1442   :  { %v1468_v4 = vpop.f32.mrb[10].mxu1 }
0x1443   :  { %1580 = vtanh.f32 %v928_v9  ;;  %v1180_v2 = vadd.f32 %v1468_v4, %v1251_v15  ;;  %v1174_v14 = vpop.f32.mrb[11].mxu1 }
0x1444   :  { %v1175_v16 = vadd.f32 %v1251_v15, %v1174_v14 }
0x1445   :  { %1215 = vst.msk [vmem:[%s1922_s4 + $0x8] sm:$0xff] %vm1213_vm6, %v1180_v2 }
0x1446   :  { %1214 = vst.msk [vmem:[%s1922_s4] sm:$0xff] %vm1213_vm6, %v1175_v16  ;;  %v1471_v18 = vpop.f32.mrb[12].mxu1 }
0x1447   :  { %v1190_v5 = vadd.f32 %v1471_v18, %v1251_v15  ;;  %v1184_v1 = vpop.f32.mrb[13].mxu1 }
0x1448   :  { %v1185_v17 = vadd.f32 %v1251_v15, %v1184_v1 }
0x1449   :  { %1217 = vst.msk [vmem:[%s1922_s4 + $0x18] sm:$0xff] %vm1213_vm6, %v1190_v5 }
0x144a   :  { %1216 = vst.msk [vmem:[%s1922_s4 + $0x10] sm:$0xff] %vm1213_vm6, %v1185_v17  ;;  %v1474_v19 = vpop.f32.mrb[14].mxu1 }
0x144b   :  { %v1200_v20 = vadd.f32 %v1474_v19, %v1251_v15  ;;  %v1194_v21 = vpop.f32.mrb[15].mxu1 }
0x144c   :  { %v1195_v22 = vadd.f32 %v1251_v15, %v1194_v21 }
0x144d   :  { %v1581_v23 = vpop.eup %1580  ;;  %1219 = vst.msk [vmem:[%s1922_s4 + $0x28] sm:$0xff] %vm1213_vm6, %v1200_v20 }
0x144e   :  { %1218 = vst.msk [vmem:[%s1922_s4 + $0x20] sm:$0xff] %vm1213_vm6, %v1195_v22  ;;  %v930_v24 = vmul.f32 %v1581_v23, %v1676_v25 }
0x1450   :  { %v931_v26 = vadd.f32 %v930_v24, %v1679_v29 }
0x1452   :  { %934 = vrot.lane.b32.xlu0 %v931_v26, %s1588_s10  ;;  %v932_v31 = vmul.f32 %v931_v26, %v1838_v46 }
0x14c4   :  { %v935_v27 = vpop.permute.xlu0 %934 }
0x14c5   :  { %v937_v30 = vmul.f32 %v935_v27, %v931_v26 }
0x14c7   :  { %939 = vrot.lane.b32.xlu1 %v937_v30, %s1589_s11 }
0x1539   :  { %v940_v32 = vpop.permute.xlu1 %939 }
0x153a   :  { %v942_v40 = vadd.f32 %v940_v32, %v932_v31 }
0x153c   :  { %1582 = vtanh.f32 %v942_v40 }
0x1546   :  { %v1583_v33 = vpop.eup %1582 }
0x1547   :  { %945 = vrot.lane.b32.xlu0 %v1583_v33, %s1588_s10 }
0x15b9   :  { %v946_v34 = vpop.permute.xlu0 %945 }
0x15ba   :  { %v948_v7 = vmul.f32 %v946_v34, %v931_v26 }
0x15bc   :  { %962 = vrot.lane.b32.xlu1 %v948_v7, %s1589_s11 }
0x162e   :  { %v963_v25 = vpop.permute.xlu1 %962 }
0x162f   :  { %1460 = vmatmul.mubr.msk.f32.gmra.mrb[20].mxu0 %vm34_vm0, %v963_v25 }
0x1702   :  { %v1461_v29 = vpop.f32.mrb[20].mxu0 }
0x1703   :  { %v1068_v35 = vadd.f32 %v1461_v29, %v1852_v53  ;;  %v1062_v36 = vpop.f32.mrb[21].mxu0 }
0x1704   :  { %v1063_v28 = vadd.f32 %v1852_v53, %v1062_v36 }
0x1705   :  { %v1078_v38 = vmax.f32 %v1068_v35, 0.0 }
0x1706   :  { %v1077_v37 = vmax.f32 %v1063_v28, 0.0 }
0x1708   :  { %1475 = vmatprep.mubr.msk.f32.mxu1 %vm1083_vm5, %v1077_v37 }
0x1709   :  { %1476 = vmatmul.mubr.msk.f32.gmra.mrb[16].mxu1 %vm1083_vm5, %v1078_v38 }
0x17dc   :  { %v1477_v39 = vpop.f32.mrb[16].mxu1 }
0x17dd   :  { %v1210_v41 = vadd.f32 %v1477_v39, %v1251_v15  ;;  %v1204_v42 = vpop.f32.mrb[17].mxu1 }
0x17de   :  { %v1205_v6 = vadd.f32 %v1251_v15, %v1204_v42 }
0x17df   :  { %1221 = vst.msk [vmem:[%s1922_s4 + $0x38] sm:$0xff] %vm1213_vm6, %v1210_v41 }
0x17e0   :  { %1220 = vst.msk [vmem:[%s1922_s4 + $0x30] sm:$0xff] %vm1213_vm6, %v1205_v6 }

</bundles_post_ra>
